<compile_context>
chip_gen: v7x
topology: tpu7x:2x2x1
jax: 0.10.0
libtpu: 0.0.40
codegen_flags: <defaults>
</compile_context>

<pallas_src>
from functools import partial

import numpy as np
import jax
import jax.numpy as jnp
from jax.experimental import pallas as pl
from jax.experimental.pallas import tpu as pltpu


# ----------------------------------------------------------------------------
# Fused tiled GEMM kernel:  out = relu( (A @ B) * scale + bias [+ residual] )
# ----------------------------------------------------------------------------

def _fused_gemm_kernel(*refs, relu, has_res):
    if has_res:
        a_ref, b_ref, s_ref, c_ref, r_ref, o_ref, acc_ref = refs
    else:
        a_ref, b_ref, s_ref, c_ref, o_ref, acc_ref = refs
        r_ref = None

    k = pl.program_id(2)

    @pl.when(k == 0)
    def _init():
        acc_ref[...] = jnp.zeros_like(acc_ref)

    acc_ref[...] += jnp.dot(a_ref[...], b_ref[...],
                            preferred_element_type=jnp.float32)

    @pl.when(k == pl.num_programs(2) - 1)
    def _finalize():
        y = acc_ref[...] * s_ref[...] + c_ref[...]
        if has_res:
            y = y + r_ref[...]
        if relu:
            y = jnp.maximum(y, 0.0)
        o_ref[...] = y


def _round_up(x, m):
    return (x + m - 1) // m * m


def _pad2d(x, rows, cols, dtype):
    x = x.astype(dtype)
    r, c = x.shape
    if (r, c) != (rows, cols):
        x = jnp.pad(x, ((0, rows - r), (0, cols - c)))
    return x


def fused_gemm(a, b, scale, bias, residual=None, relu=False,
               tm=256, tn=128, tk=512):
    """out[:M,:N] = epilogue(A @ B) with bf16 MXU operands, f32 accumulation.

    A: (M, K) activations/patches, B: (K, N) weights, scale/bias: (N,) folded
    BatchNorm, residual: optional (M, N) added before the final ReLU.
    """
    M, K = a.shape
    K2, N = b.shape
    assert K == K2

    tm = min(tm, _round_up(M, 16))
    tk = min(tk, _round_up(K, 128))
    tn = min(tn, _round_up(N, 128))
    Mp, Kp, Np = _round_up(M, tm), _round_up(K, tk), _round_up(N, tn)

    a_p = _pad2d(a, Mp, Kp, jnp.bfloat16)
    b_p = _pad2d(b, Kp, Np, jnp.bfloat16)
    s_p = _pad2d(scale.reshape(1, N), 1, Np, jnp.float32)
    c_p = _pad2d(bias.reshape(1, N), 1, Np, jnp.float32)

    ins = [a_p, b_p, s_p, c_p]
    in_specs = [
        pl.BlockSpec((tm, tk), lambda i, j, k: (i, k)),
        pl.BlockSpec((tk, tn), lambda i, j, k: (k, j)),
        pl.BlockSpec((1, tn), lambda i, j, k: (0, j)),
        pl.BlockSpec((1, tn), lambda i, j, k: (0, j)),
    ]
    has_res = residual is not None
    if has_res:
        ins.append(_pad2d(residual, Mp, Np, jnp.float32))
        in_specs.append(pl.BlockSpec((tm, tn), lambda i, j, k: (i, j)))

    grid = (Mp // tm, Np // tn, Kp // tk)

    out = pl.pallas_call(
        partial(_fused_gemm_kernel, relu=relu, has_res=has_res),
        out_shape=jax.ShapeDtypeStruct((Mp, Np), jnp.float32),
        grid_spec=pltpu.PrefetchScalarGridSpec(
            num_scalar_prefetch=0,
            grid=grid,
            in_specs=in_specs,
            out_specs=pl.BlockSpec((tm, tn), lambda i, j, k: (i, j)),
            scratch_shapes=[pltpu.VMEM((tm, tn), jnp.float32)],
        ),
        compiler_params=pltpu.CompilerParams(
            dimension_semantics=("parallel", "parallel", "arbitrary")),
    )(*ins)

    return out[:M, :N]


# ----------------------------------------------------------------------------
# Convolution wrappers (NHWC activations, HWIO weights) feeding the fused GEMM
# ----------------------------------------------------------------------------

def bn_fold(bn, eps=1e-5):
    scale = bn["gamma"] / jnp.sqrt(bn["var"] + eps)
    bias = bn["beta"] - bn["mean"] * scale
    return scale, bias


def conv1x1_bn(x, w, scale, bias, stride=1, relu=True, residual=None):
    """1x1 conv (no conv bias) + folded BN (+ optional residual) (+ ReLU)."""
    if stride > 1:
        x = x[:, ::stride, ::stride, :]
    N, H, W, C = x.shape
    Cout = w.shape[-1]
    res2d = None if residual is None else residual.reshape(N * H * W, Cout)
    y = fused_gemm(x.reshape(N * H * W, C), w.reshape(C, Cout),
                   scale, bias, residual=res2d, relu=relu)
    return y.reshape(N, H, W, Cout)


def conv3x3_bn_relu(x, w, scale, bias, stride=1, dilation=1):
    """3x3 conv (padding=dilation, as in Bottleneck) + folded BN + ReLU."""
    N, H, W, C = x.shape
    KH, KW, Cin, Cout = w.shape
    assert Cin == C
    pad = dilation
    xp = jnp.pad(x, ((0, 0), (pad, pad), (pad, pad), (0, 0)))
    Hp, Wp = H + 2 * pad, W + 2 * pad
    Ho = (Hp - dilation * (KH - 1) - 1) // stride + 1
    Wo = (Wp - dilation * (KW - 1) - 1) // stride + 1
    cols = []
    for kh in range(KH):
        for kw in range(KW):
            h0, w0 = kh * dilation, kw * dilation
            cols.append(xp[:, h0:h0 + (Ho - 1) * stride + 1:stride,
                           w0:w0 + (Wo - 1) * stride + 1:stride, :])
    patches = jnp.concatenate(cols, axis=-1).reshape(N * Ho * Wo, KH * KW * C)
    y = fused_gemm(patches, w.reshape(KH * KW * Cin, Cout), scale, bias,
                   relu=True)
    return y.reshape(N, Ho, Wo, Cout)


# ----------------------------------------------------------------------------
# Bottleneck forward (public wrapper takes / returns NCHW like PyTorch)
# ----------------------------------------------------------------------------

def bottleneck_forward(p, x_nchw):
    x = jnp.transpose(x_nchw.astype(jnp.float32), (0, 2, 3, 1))   # NCHW -> NHWC

    s1, b1 = bn_fold(p["bn1"])
    s2, b2 = bn_fold(p["bn2"])
    s3, b3 = bn_fold(p["bn3"])

    out = conv1x1_bn(x, p["conv1_w"], s1, b1, relu=True)
    out = conv3x3_bn_relu(out, p["conv2_w"], s2, b2,
                          stride=p["stride"], dilation=p["rate"])

    if p.get("downsample") is not None:
        ds = p["downsample"]
        sd, bd = bn_fold(ds["bn"])
        residual = conv1x1_bn(x, ds["w"], sd, bd, stride=p["stride"],
                              relu=False)
    else:
        residual = x

    # conv3 + bn3 + residual add + ReLU, all fused into one GEMM epilogue.
    out = conv1x1_bn(out, p["conv3_w"], s3, b3, relu=True, residual=residual)
    return jnp.transpose(out, (0, 3, 1, 2))                       # back to NCHW


# ----------------------------------------------------------------------------
# Pure-JAX reference (same bf16-operand / f32-accumulate MXU semantics)
# ----------------------------------------------------------------------------

def _conv_ref(x, w, stride=1, dilation=1, pad=0):
    return jax.lax.conv_general_dilated(
        x.astype(jnp.bfloat16), w.astype(jnp.bfloat16),
        window_strides=(stride, stride),
        padding=((pad, pad), (pad, pad)),
        rhs_dilation=(dilation, dilation),
        dimension_numbers=("NHWC", "HWIO", "NHWC"),
        preferred_element_type=jnp.float32)


def bottleneck_ref(p, x_nchw):
    x = jnp.transpose(x_nchw.astype(jnp.float32), (0, 2, 3, 1))

    def bn(v, b, eps=1e-5):
        s = b["gamma"] / jnp.sqrt(b["var"] + eps)
        return v * s + (b["beta"] - b["mean"] * s)

    out = jax.nn.relu(bn(_conv_ref(x, p["conv1_w"]), p["bn1"]))
    out = jax.nn.relu(bn(_conv_ref(out, p["conv2_w"], stride=p["stride"],
                                   dilation=p["rate"], pad=p["rate"]),
                         p["bn2"]))
    out = bn(_conv_ref(out, p["conv3_w"]), p["bn3"])
    if p.get("downsample") is not None:
        ds = p["downsample"]
        residual = bn(_conv_ref(x, ds["w"], stride=p["stride"]), ds["bn"])
    else:
        residual = x
    out = jax.nn.relu(out + residual)
    return jnp.transpose(out, (0, 3, 1, 2))


# ----------------------------------------------------------------------------
# Deterministic parameter initialization
# ----------------------------------------------------------------------------

def _bn_params(key, c):
    kg, kb, km, kv = jax.random.split(key, 4)
    return {"gamma": jax.random.uniform(kg, (c,), jnp.float32, 0.5, 1.5),
            "beta": jax.random.normal(kb, (c,), jnp.float32) * 0.1,
            "mean": jax.random.normal(km, (c,), jnp.float32) * 0.1,
            "var": jax.random.uniform(kv, (c,), jnp.float32, 0.5, 1.5)}


def init_bottleneck_params(key, inplanes, planes, stride=1, rate=1,
                           with_downsample=False):
    expansion = 4
    k1, k2, k3, k4, kbn = jax.random.split(key, 5)
    kb1, kb2, kb3, kb4 = jax.random.split(kbn, 4)
    p = {
        "conv1_w": jax.random.normal(k1, (1, 1, inplanes, planes),
                                     jnp.float32) * 0.05,
        "bn1": _bn_params(kb1, planes),
        "conv2_w": jax.random.normal(k2, (3, 3, planes, planes),
                                     jnp.float32) * 0.05,
        "bn2": _bn_params(kb2, planes),
        "conv3_w": jax.random.normal(k3, (1, 1, planes, planes * expansion),
                                     jnp.float32) * 0.05,
        "bn3": _bn_params(kb3, planes * expansion),
        "stride": stride,
        "rate": rate,
        "downsample": None,
    }
    if with_downsample:
        p["downsample"] = {
            "w": jax.random.normal(k4, (1, 1, inplanes, planes * expansion),
                                   jnp.float32) * 0.05,
            "bn": _bn_params(kb4, planes * expansion),
        }
    return p


# ----------------------------------------------------------------------------
# Demo
# ----------------------------------------------------------------------------

if __name__ == "__main__":
    key = jax.random.PRNGKey(0)
    kx, kp1, kp2, kp3 = jax.random.split(key, 4)

    # Input: NCHW like the PyTorch module.
    x = jax.random.normal(kx, (2, 64, 16, 16), jnp.float32)

    # Block 1: identity residual (inplanes == planes*expansion), stride 1.
    p1 = init_bottleneck_params(kp1, inplanes=64, planes=16, stride=1, rate=1)
    y1 = bottleneck_forward(p1, x)

    # Block 2: stride 2 with a 1x1-conv + BN downsample on the residual path.
    p2 = init_bottleneck_params(kp2, inplanes=64, planes=16, stride=2, rate=1,
                                with_downsample=True)
    y2 = bottleneck_forward(p2, x)

    # Block 3: dilated conv2 (rate=2), identity residual.
    p3 = init_bottleneck_params(kp3, inplanes=64, planes=16, stride=1, rate=2)
    y3 = bottleneck_forward(p3, x)

    jax.block_until_ready((y1, y2, y3))

    assert y1.shape == (2, 64, 16, 16), y1.shape
    assert y2.shape == (2, 64, 8, 8), y2.shape
    assert y3.shape == (2, 64, 16, 16), y3.shape

    r1 = bottleneck_ref(p1, x)
    r2 = bottleneck_ref(p2, x)
    r3 = bottleneck_ref(p3, x)
    np.testing.assert_allclose(np.asarray(y1), np.asarray(r1),
                               rtol=1e-2, atol=1e-2)
    np.testing.assert_allclose(np.asarray(y2), np.asarray(r2),
                               rtol=1e-2, atol=1e-2)
    np.testing.assert_allclose(np.asarray(y3), np.asarray(r3),
                               rtol=1e-2, atol=1e-2)
    assert bool(jnp.all(jnp.isfinite(y1)))
    assert bool(jnp.all(jnp.isfinite(y2)))
    assert bool(jnp.all(jnp.isfinite(y3)))

    print("KERNEL_OK")
</pallas_src>

<mosaic_0001>
module attributes {stable_mosaic.version = 11 : i64} {
  func.func @_fused_gemm_kernel(%arg0: i32, %arg1: i32, %arg2: i32, %arg3: memref<256x128xbf16, #tpu.memory_space<vmem>>, %arg4: memref<128x128xbf16, #tpu.memory_space<vmem>>, %arg5: memref<1x128xf32, #tpu.memory_space<vmem>>, %arg6: memref<1x128xf32, #tpu.memory_space<vmem>>, %arg7: memref<256x128xf32, #tpu.memory_space<vmem>>, %arg8: memref<256x128xf32, #tpu.memory_space<vmem>>) attributes {dimension_semantics = [#tpu.dimension_semantics<parallel>, #tpu.dimension_semantics<parallel>, #tpu.dimension_semantics<arbitrary>], iteration_bounds = array<i64: 2, 1, 1>, scalar_prefetch = 0 : i64, scratch_operands = 1 : i64, tpu.core_type = #tpu.core_type<tc>, window_params = [{transform_indices = @transform_0, window_bounds = array<i64: 256, 128>}, {transform_indices = @transform_1, window_bounds = array<i64: 128, 128>}, {transform_indices = @transform_2, window_bounds = array<i64: 1, 128>}, {transform_indices = @transform_3, window_bounds = array<i64: 1, 128>}, {transform_indices = @transform_4, window_bounds = array<i64: 256, 128>}]} {
    %c0_i32 = arith.constant 0 : i32
    %0 = arith.cmpi eq, %arg2, %c0_i32 : i32
    %1 = arith.extui %0 : i1 to i32
    %c0_i32_0 = arith.constant 0 : i32
    %2 = arith.cmpi ne, %1, %c0_i32_0 : i32
    scf.if %2 {
      %cst_10 = arith.constant 0.000000e+00 : f32
      %12 = vector.broadcast %cst_10 : f32 to vector<256x128xf32>
      %c0_11 = arith.constant 0 : index
      %c0_12 = arith.constant 0 : index
      %13 = vector.load %arg8[%c0_11, %c0_12] : memref<256x128xf32, #tpu.memory_space<vmem>>, vector<256x128xf32>
      tpu.vector_store %arg8[%c0_11, %c0_12], %12 {strides = array<i32>} : memref<256x128xf32, #tpu.memory_space<vmem>>, vector<256x128xf32>,
    } else {
    }
    %c0 = arith.constant 0 : index
    %c0_1 = arith.constant 0 : index
    %3 = vector.load %arg8[%c0, %c0_1] : memref<256x128xf32, #tpu.memory_space<vmem>>, vector<256x128xf32>
    %c0_2 = arith.constant 0 : index
    %c0_3 = arith.constant 0 : index
    %4 = vector.load %arg3[%c0_2, %c0_3] : memref<256x128xbf16, #tpu.memory_space<vmem>>, vector<256x128xbf16>
    %c0_4 = arith.constant 0 : index
    %c0_5 = arith.constant 0 : index
    %5 = vector.load %arg4[%c0_4, %c0_5] : memref<128x128xbf16, #tpu.memory_space<vmem>>, vector<128x128xbf16>
    %cst = arith.constant dense<0.000000e+00> : vector<256x128xf32>
    %6 = tpu.matmul %4, %5, %cst {dimension_numbers = #tpu.dot_dimension_numbers<[1], [0], [0], [1], [0, 0, 1, 1], [], []>} : vector<256x128xbf16>, vector<128x128xbf16>, vector<256x128xf32> -> vector<256x128xf32>
    %7 = arith.addf %3, %6 : vector<256x128xf32>
    %c0_6 = arith.constant 0 : index
    %c0_7 = arith.constant 0 : index
    %8 = vector.load %arg8[%c0_6, %c0_7] : memref<256x128xf32, #tpu.memory_space<vmem>>, vector<256x128xf32>
    tpu.vector_store %arg8[%c0_6, %c0_7], %7 {strides = array<i32>} : memref<256x128xf32, #tpu.memory_space<vmem>>, vector<256x128xf32>,
    %c0_i32_8 = arith.constant 0 : i32
    %9 = arith.cmpi eq, %arg2, %c0_i32_8 : i32
    %10 = arith.extui %9 : i1 to i32
    %c0_i32_9 = arith.constant 0 : i32
    %11 = arith.cmpi ne, %10, %c0_i32_9 : i32
    scf.if %11 {
      %c0_10 = arith.constant 0 : index
      %c0_11 = arith.constant 0 : index
      %12 = vector.load %arg8[%c0_10, %c0_11] : memref<256x128xf32, #tpu.memory_space<vmem>>, vector<256x128xf32>
      %c0_12 = arith.constant 0 : index
      %c0_13 = arith.constant 0 : index
      %13 = vector.load %arg5[%c0_12, %c0_13] : memref<1x128xf32, #tpu.memory_space<vmem>>, vector<1x128xf32>
      %14 = vector.broadcast %13 : vector<1x128xf32> to vector<256x128xf32>
      %15 = arith.mulf %12, %14 : vector<256x128xf32>
      %c0_14 = arith.constant 0 : index
      %c0_15 = arith.constant 0 : index
      %16 = vector.load %arg6[%c0_14, %c0_15] : memref<1x128xf32, #tpu.memory_space<vmem>>, vector<1x128xf32>
      %17 = vector.broadcast %16 : vector<1x128xf32> to vector<256x128xf32>
      %18 = arith.addf %15, %17 : vector<256x128xf32>
      %cst_16 = arith.constant 0.000000e+00 : f32
      %19 = vector.broadcast %cst_16 : f32 to vector<256x128xf32>
      %20 = arith.maximumf %18, %19 : vector<256x128xf32>
      %c0_17 = arith.constant 0 : index
      %c0_18 = arith.constant 0 : index
      %21 = vector.load %arg7[%c0_17, %c0_18] : memref<256x128xf32, #tpu.memory_space<vmem>>, vector<256x128xf32>
      tpu.vector_store %arg7[%c0_17, %c0_18], %20 {strides = array<i32>} : memref<256x128xf32, #tpu.memory_space<vmem>>, vector<256x128xf32>,
    } else {
    }
    return
  }
  func.func @transform_0(%arg0: i32, %arg1: i32, %arg2: i32) -> (i32, i32) {
    %c0_i32 = arith.constant 0 : i32
    return %arg0, %arg2 : i32, i32
  }
  func.func @transform_1(%arg0: i32, %arg1: i32, %arg2: i32) -> (i32, i32) {
    %c0_i32 = arith.constant 0 : i32
    return %arg2, %arg1 : i32, i32
  }
  func.func @transform_2(%arg0: i32, %arg1: i32, %arg2: i32) -> (i32, i32) {
    %c0_i32 = arith.constant 0 : i32
    %c0_i32_0 = arith.constant 0 : i32
    return %c0_i32, %arg1 : i32, i32
  }
  func.func @transform_3(%arg0: i32, %arg1: i32, %arg2: i32) -> (i32, i32) {
    %c0_i32 = arith.constant 0 : i32
    %c0_i32_0 = arith.constant 0 : i32
    return %c0_i32, %arg1 : i32, i32
  }
  func.func @transform_4(%arg0: i32, %arg1: i32, %arg2: i32) -> (i32, i32) {
    %c0_i32 = arith.constant 0 : i32
    return %arg0, %arg1 : i32, i32
  }
}

</mosaic_0001>

<bundles_post_ra>
// kernel: tpu_custom_call.1
= control target key start
LH: loop header
LB: loop body
LE: loop exit
PB: predicated region body
PF: predicated region fallthrough
CT: control target
= control target key end

     0   :  { %9 = vsyncpa [#allocation4], 0  ;;  %s1868_s0 = inlined_call_operand.hbm [shape: bf16[512,128], index: 0, kind: input, shape index: {}]   ;;  %s1869_s1 = inlined_call_operand.hbm [shape: bf16[128,128], index: 1, kind: input, shape index: {}]   ;;  %s1870_s2 = inlined_call_operand.vmem [shape: f32[1,128], index: 2, kind: input, shape index: {}]   ;;  %s1871_s3 = inlined_call_operand.vmem [shape: f32[1,128], index: 3, kind: input, shape index: {}]   ;;  %s1872_s4 = inlined_call_operand.hbm [shape: f32[512,128], index: 4, kind: output, shape index: {}]  }
   0x1   :  { %11 = vsyncpa [#allocation4 + $0x1], 0 }
   0x2   :  { %12 = vsyncpa [#allocation7], 0 }
   0x3   :  { %13 = vsyncpa [#allocation5], 0 }
   0x4   :  { %15 = vsyncpa [#allocation5 + $0x1], 0  ;;  %s1515_s15 = smov 0   ;;  %s1517_s16 = smov 0  }
   0x5   :  { %s1519_s17 = smov 0   ;;  %s1521_s18 = smov 0  }
   0x6   :  { %s1523_s19 = smov 0   ;;  %s1525_s20 = smov 0  }
   0x7 LB: > { %s1101_s21 = sadd.s32 4294967295, %s1481_s20   ;;  %s1102_s22 = sadd.s32 4294967294, %s1481_s20   ;;  %s1481_s20 = sphi %s1525_s20, %s21_s20   ;;  %s1477_s19 = sphi %s1523_s19, %s1896_s19   ;;  %s1473_s18 = sphi %s1521_s18, %s1895_s18   ;;  %s1469_s17 = sphi %s1519_s17, %s1894_s17   ;;  %s1465_s16 = sphi %s1517_s16, %s1893_s16   ;;  %s1461_s15 = sphi %s1515_s15, %s1892_s15  }
   0x8   : > { %p62_p0 = scmp.ne.s32.totalorder %s1465_s16, %s1461_s15  ;;  %p1549_p1 = scmp.eq.s32.totalorder %s1101_s21, 0 }
   0x9   : > { %p1553_p2 = scmp.eq.s32.totalorder %s1101_s21, 1  ;;  %p174_p3 = scmp.eq.s32.totalorder %s1102_s22, 1 }
   0xa   : > { %s1877_s23 = scalar_select %p1549_p1, 1, 0 }
   0xb   : > { %s1878_s24 = scalar_select %p1553_p2, 1, 0 }
   0xc   : > { %p1559_p4 = por %p1549_p1, %p62_p0  ;;  %p1103_p5 = scmp.ge.s32.totalorder %s1481_s20, 1 }
   0xd   : > { %p1564_p6 = por %p174_p3, %p62_p0  ;;  %p181_p7 = scmp.lt.s32.totalorder %s1481_s20, 3 }
   0xe   : > { %s1879_s25 = scalar_select %p1559_p4, 1, 0 }
   0xf   : > { %s1880_s26 = scalar_select %p1564_p6, 1, 0 }
  0x10   : > { %p1569_p8 = pnand %p1103_p5, %p181_p7  ;;  %s1483_s28 = smov [#allocation6]  }
  0x11   : > { %s197_s29 = sshll.u32 %s1483_s28, 4  ;;  %s40_s5 = sadd.s32 1, %s1477_s19  ;;  %s198_s29 = int_to_ptr.vmem [resolvable:$true] %s197_s29 }
  0x12   : > { %s1881_s27 = scalar_select %p1569_p8, 1, 0 }
  0x13   : > { %p1244_p9 = pneg %p1569_p8  ;;  %s1337_s8 = scalar_lea.hbm %s1869_s1, 1024 }
  0x14   : > { %p1338_p12 = scmp.ne.s32.totalorder %s1869_s1, %s1337_s8  ;;  %p1344_p5 = scmp.lt.u32.totalorder %s1337_s8, %s1869_s1 }
  0x15   : > { %p1578_p11 = pnand %p1244_p9, %p1549_p1 }
  0x17   : > { %p1339_p13 = pneg %p1578_p11 }
  0x19   : > { %p1340_p0 = pnand %p1339_p13, %p1338_p12 }
  0x1b   : > { %p1341_p3 = pneg %p1340_p0 }
  0x1d   : > { %p1346_p7 = pnand %p1344_p5, %p1341_p3 }
  0x1f   : > { %1349 = shalt.err (!%p1346_p7)
}
  0x20   : > { %s1350_s13 = scalar_lea.vmem %s198_s29, 1024  ;;  %p1358_p1 = scmp.lt.s32.totalorder %s198_s29, %s198_s29 }
  0x21   : > { %p1351_p9 = scmp.ne.s32.totalorder %s198_s29, %s1350_s13  ;;  %p1359_p4 = scmp.lt.s32.totalorder %s1350_s13, %s1350_s13 }
  0x23   : > { %p1353_p10 = pnand %p1351_p9, %p1339_p13  ;;  %p1360_p8 = por %p1359_p4, %p1358_p1 }
  0x25   : > { %p1354_p6 = pneg %p1353_p10 }
  0x27   : > { %p1361_p2 = pnand %p1360_p8, %p1354_p6 }
  0x29   : > { %1364 = shalt.err (!%p1361_p2)
}
  0x2a   : > { %s1484_s14 = smov 64   ;;  %s1485_s21 = smov 4  }
  0x2b   : > { %1247 = dma.hbm_to_vmem [thread:$0]  (!%p1578_p11), %s1869_s1, 1024, %s198_s29, [#allocation7], %s1484_s14, %s1484_s14, %s1485_s21  }
  0x2c   : > { %p42_p1 = scmp.ge.s32.totalorder %s40_s5, 2  ;;  %s49_s6 = sadd.s32 1, %s1469_s17 }
  0x2d   : > { %p56_p2 = scmp.ne.s32.totalorder %s1469_s17, %s1465_s16  ;;  %p57_p4 = scmp.eq.s32.totalorder %s1481_s20, 0 }
  0x2e   : > { %s1898_s5 = smov (%p42_p1, %s40_s5), 0  ;;  %p1884_p8 = scmp.ne.s32.totalorder %s1878_s24, 0 }
  0x2f   : > { %p1608_p6 = por %p57_p4, %p56_p2  ;;  %s44_s8 = ssub.s32 %s1477_s19, %s1898_s5 }
  0x30   : > { %p1614_p10 = por %p1884_p8, %p56_p2  ;;  %p1257_p12 = scmp.lt.s32.totalorder %s1481_s20, 2 }
  0x31   : > { %p47_p11 = scmp.eq.s32.totalorder %s44_s8, 0  ;;  %s223_s29 = sand.u32 1, %s1469_s17  }
  0x32   : > { %s1108_s9 = sshll.u32 %s223_s29, 7  ;;  %s1146_s11 = sshll.u32 %s1477_s19, 11 }
  0x33   : > { %s1623_s10 = scalar_select %p47_p11, %s1469_s17, %s49_s6  }
  0x34   : > { %s1629_s22 = scalar_lea.hbm %s1868_s0, %s1146_s11  ;;  %s227_s24 = scalar_lea.vmem [#allocation3], %s1108_s9 }
  0x35   : > { %s235_s28 = sshll.u32 %s227_s24, 4  ;;  %p1635_p13 = pnand %p1257_p12, %p1608_p6  ;;  %s1631_s28 = int_to_ptr.vmem [resolvable:$true] %s235_s28 }
  0x36   : > { %s1639_s6 = scalar_lea.sflag [#allocation4], %s223_s29  ;;  %s1365_s12 = scalar_lea.hbm %s1629_s22, 2048 }
  0x37   : > { %p1366_p0 = scmp.ne.s32.totalorder %s1629_s22, %s1365_s12  ;;  %p1367_p3 = pneg %p1635_p13 }
  0x38   : > { %s1370_s7 = scalar_lea.hbm %s1868_s0, 4096  ;;  %p1371_p9 = scmp.lt.u32.totalorder %s1629_s22, %s1868_s0 }
  0x39   : > { %p1368_p5 = pnand %p1367_p3, %p1366_p0  ;;  %p1372_p1 = scmp.lt.u32.totalorder %s1370_s7, %s1365_s12 }
  0x3a   : > { %p1374_p4 = scmp.lt.u32.totalorder %s1365_s12, %s1629_s22 }
  0x3b   : > { %p1369_p7 = pneg %p1368_p5  ;;  %p1373_p2 = por %p1372_p1, %p1371_p9 }
  0x3d   : > { %p1375_p6 = por %p1374_p4, %p1373_p2 }
  0x3f   : > { %p1376_p8 = pnand %p1375_p6, %p1369_p7 }
  0x41   : > { %1379 = shalt.err (!%p1376_p8)
}
  0x42   : > { %s1380_s29 = scalar_lea.vmem %s1631_s28, 2048  ;;  %s1486_s9 = smov [#allocation3]  }
  0x43   : > { %p1381_p12 = scmp.ne.s32.totalorder %s1631_s28, %s1380_s29  ;;  %s1385_s11 = sshll.u32 %s1486_s9, 4  ;;  %s1386_s11 = int_to_ptr.vmem [resolvable:$false] %s1385_s11 }
  0x44   : > { %s1387_s13 = scalar_lea.vmem %s1386_s11, 4096  ;;  %p1388_p5 = scmp.lt.s32.totalorder %s1631_s28, %s1386_s11 }
  0x45   : > { %p1383_p11 = pnand %p1381_p12, %p1367_p3  ;;  %p1389_p9 = scmp.lt.s32.totalorder %s1387_s13, %s1380_s29 }
  0x47   : > { %p1384_p0 = pneg %p1383_p11  ;;  %p1390_p1 = por %p1389_p9, %p1388_p5 }
  0x49   : > { %p1391_p2 = pnand %p1390_p1, %p1384_p0 }
  0x4b   : > { %1394 = shalt.err (!%p1391_p2)
}
  0x4c   : > { %1251 = dma.hbm_to_vmem [thread:$0]  (!%p1635_p13), %s1629_s22, 2048, %s1631_s28, %s1639_s6, %s1484_s14, %s1484_s14, %s1485_s21  }
  0x4d   : > { %p1887_p3 = scmp.ne.s32.totalorder %s1881_s27, 0 }
  0x4e   : > { %s1673_s12 = sand.u32 (!%p1887_p3), 1, %s1465_s16   ;;  %p1888_p7 = scmp.ne.s32.totalorder (!%p1887_p3), %s1879_s25, 0 }
  0x4f   : > { %247 = sbr.rel (%p1887_p3) target bundleno = 383 (0x17f), region = 36  ;;  %s1112_s7 = sshll.u32 (!%p1887_p3), %s1673_s12, 7 }
  0x50   : > { %s250_s24 = scalar_lea.sflag (!%p1887_p3), [#allocation4], %s1673_s12  ;;  %s1677_s29 = scalar_lea.vmem (!%p1887_p3), [#allocation3], %s1112_s7 }
  0x56   : > { %1448 = dma.done.wait (%p1888_p7), %s250_s24, 2048  }
  0x57   : > { %1450 = vsyncadd (%p1888_p7), %s250_s24, 4294965248  ;;  %p1889_p13 = scmp.ne.s32.totalorder %s1877_s23, 0 }
  0x59   : > { %1452 = dma.done.wait (%p1889_p13), [#allocation7], 1024  }
  0x5a   : > { %1454 = vsyncadd (%p1889_p13), [#allocation7], 4294966272  ;;  %v1313_v0 = vld [vmem:[#allocation6] sm:$0xff]   ;;  %v1314_v1 = vld [vmem:[#allocation6 + $0x8] sm:$0xff]   ;;  %s1114_s21 = sshll.u32 %s1673_s12, 8  ;;  %s1147_s28 = sshll.u32 %s1473_s18, 12 }
  0x5b   : > { %1172 = vmatprep.subr.bf16.mxu0 %v1313_v0  ;;  %1220 = vmatprep.subr.bf16.mxu1 %v1313_v0  ;;  %v1315_v2 = vld [vmem:[#allocation6 + $0x10] sm:$0xff]   ;;  %v1316_v3 = vld [vmem:[#allocation6 + $0x18] sm:$0xff]   ;;  %v1321_v4 = vld [vmem:[%s1677_s29] sm:$0xff]   ;;  %s1730_s22 = scalar_lea.vmem [#allocation8], %s1114_s21  ;;  %s1811_s9 = scalar_lea.hbm %s1872_s4, %s1147_s28 }
  0x5c   : > { %1173 = vmatpush3.bf16.msra.mxu0 %v1313_v0  ;;  %1228 = vmatpush3.bf16.msra.mxu1 %v1313_v0  ;;  %v1322_v5 = vld [vmem:[%s1677_s29 + $0x40] sm:$0xff]   ;;  %v1318_v7 = vld [vmem:[#allocation6 + $0x28] sm:$0xff]   ;;  %v1319_v8 = vld [vmem:[#allocation6 + $0x30] sm:$0xff]   ;;  %s975_s8 = sshll.u32 %s1730_s22, 4  ;;  %s961_s11 = scalar_lea.sflag [#allocation5], %s1673_s12  ;;  %s1813_s8 = int_to_ptr.vmem [resolvable:$true] %s975_s8 }
  0x5d   : > { %1174 = vmatprep.subr.bf16.mxu0 %v1314_v1  ;;  %1221 = vmatprep.subr.bf16.mxu1 %v1314_v1  ;;  %v1317_v6 = vld [vmem:[#allocation6 + $0x20] sm:$0xff]   ;;  %v1320_v9 = vld [vmem:[#allocation6 + $0x38] sm:$0xff]   ;;  %v1323_v10 = vld [vmem:[%s1677_s29 + $0x8] sm:$0xff]   ;;  %s1395_s13 = scalar_lea.vmem %s1813_s8, 4096  ;;  %s1487_s7 = smov [#allocation8]  }
  0x5e   : > { %1188 = vmatprep.mubr.bf16.mxu0 %v1321_v4  ;;  %1204 = vmatprep.mubr.bf16.mxu1 %v1322_v5  ;;  %v1324_v11 = vld [vmem:[%s1677_s29 + $0x48] sm:$0xff]   ;;  %v1325_v12 = vld [vmem:[%s1677_s29 + $0x10] sm:$0xff]   ;;  %v1327_v14 = vld [vmem:[%s1677_s29 + $0x18] sm:$0xff]   ;;  %p1396_p4 = scmp.ne.s32.totalorder %s1813_s8, %s1395_s13  ;;  %s1399_s24 = sshll.u32 %s1487_s7, 4  ;;  %s1400_s24 = int_to_ptr.vmem [resolvable:$false] %s1399_s24 }
  0x5f   : > { %v1326_v13 = vld [vmem:[%s1677_s29 + $0x50] sm:$0xff]   ;;  %v1328_v15 = vld [vmem:[%s1677_s29 + $0x58] sm:$0xff]   ;;  %v1329_v16 = vld [vmem:[%s1677_s29 + $0x20] sm:$0xff]   ;;  %p1402_p12 = scmp.lt.s32.totalorder %s1813_s8, %s1400_s24 }
  0x60   : > { %1175 = vmatpush3.bf16.msra.mxu0 %v1314_v1  ;;  %1229 = vmatpush3.bf16.msra.mxu1 %v1314_v1  ;;  %v1330_v17 = vld [vmem:[%s1677_s29 + $0x60] sm:$0xff]   ;;  %v1331_v18 = vld [vmem:[%s1677_s29 + $0x28] sm:$0xff]   ;;  %v1333_v20 = vld [vmem:[%s1677_s29 + $0x30] sm:$0xff]   ;;  %p1397_p6 = pnand %p1396_p4, %p1614_p10 }
  0x61   : > { %1176 = vmatprep.subr.bf16.mxu0 %v1315_v2  ;;  %1222 = vmatprep.subr.bf16.mxu1 %v1315_v2  ;;  %v1332_v19 = vld [vmem:[%s1677_s29 + $0x68] sm:$0xff]   ;;  %v1334_v21 = vld [vmem:[%s1677_s29 + $0x70] sm:$0xff]   ;;  %v1335_v22 = vld [vmem:[%s1677_s29 + $0x38] sm:$0xff]  }
  0x62   : > { %v1336_v23 = vld [vmem:[%s1677_s29 + $0x78] sm:$0xff]   ;;  %v1706_v24 = vld [vmem:[%s1870_s2] ss:$0 sm:$0xff]  ;;  %p1398_p8 = pneg %p1397_p6  ;;  %s1401_s29 = scalar_lea.vmem %s1400_s24, 8192 }
  0x63   : > { %v1711_v26 = vld [vmem:[%s1871_s3] ss:$0 sm:$0xff]  ;;  %p1403_p11 = scmp.lt.s32.totalorder %s1401_s29, %s1395_s13 }
  0x64   : > { %1177 = vmatpush3.bf16.msra.mxu0 %v1315_v2  ;;  %1230 = vmatpush3.bf16.msra.mxu1 %v1315_v2 }
  0x65   : > { %1178 = vmatprep.subr.bf16.mxu0 %v1316_v3  ;;  %1223 = vmatprep.subr.bf16.mxu1 %v1316_v3  ;;  %p1404_p0 = por %p1403_p11, %p1402_p12 }
  0x67   : > { %p1405_p5 = pnand %p1404_p0, %p1398_p8 }
  0x68   : > { %1179 = vmatpush3.bf16.msra.mxu0 %v1316_v3  ;;  %1231 = vmatpush3.bf16.msra.mxu1 %v1316_v3 }
  0x69   : > { %1180 = vmatprep.subr.bf16.mxu0 %v1317_v6  ;;  %1224 = vmatprep.subr.bf16.mxu1 %v1317_v6 }
  0x6c   : > { %1181 = vmatpush3.bf16.msra.mxu0 %v1317_v6  ;;  %1232 = vmatpush3.bf16.msra.mxu1 %v1317_v6 }
  0x6d   : > { %1182 = vmatprep.subr.bf16.mxu0 %v1318_v7  ;;  %1225 = vmatprep.subr.bf16.mxu1 %v1318_v7 }
  0x70   : > { %1183 = vmatpush3.bf16.msra.mxu0 %v1318_v7  ;;  %1233 = vmatpush3.bf16.msra.mxu1 %v1318_v7 }
  0x71   : > { %1184 = vmatprep.subr.bf16.mxu0 %v1319_v8  ;;  %1226 = vmatprep.subr.bf16.mxu1 %v1319_v8 }
  0x74   : > { %1185 = vmatpush3.bf16.msra.mxu0 %v1319_v8  ;;  %1234 = vmatpush3.bf16.msra.mxu1 %v1319_v8 }
  0x75   : > { %1186 = vmatprep.subr.bf16.mxu0 %v1320_v9  ;;  %1227 = vmatprep.subr.bf16.mxu1 %v1320_v9 }
  0x78   : > { %1187 = vmatpush3.bf16.msra.mxu0 %v1320_v9  ;;  %1235 = vmatpush3.bf16.msra.mxu1 %v1320_v9 }
  0x7b   : > { %1189 = vmatmul.mubr.bf16.vlgmr.msra.gmra.mrb[0].mxu0 %v1323_v10  ;;  %1205 = vmatmul.mubr.bf16.vlgmr.msra.gmra.mrb[0].mxu1 %v1324_v11 }
  0x7c   : > { %1192 = vmatprep.mubr.bf16.mxu0 %v1325_v12  ;;  %1208 = vmatprep.mubr.bf16.mxu1 %v1326_v13 }
  0x83   : > { %1193 = vmatmul.mubr.bf16.gmra.mrb[4].mxu0 %v1327_v14  ;;  %1209 = vmatmul.mubr.bf16.gmra.mrb[4].mxu1 %v1328_v15 }
  0x84   : > { %1196 = vmatprep.mubr.bf16.mxu0 %v1329_v16  ;;  %1212 = vmatprep.mubr.bf16.mxu1 %v1330_v17 }
  0x8b   : > { %1197 = vmatmul.mubr.bf16.gmra.mrb[8].mxu0 %v1331_v18  ;;  %1213 = vmatmul.mubr.bf16.gmra.mrb[8].mxu1 %v1332_v19 }
  0x8c   : > { %1200 = vmatprep.mubr.bf16.mxu0 %v1333_v20  ;;  %1216 = vmatprep.mubr.bf16.mxu1 %v1334_v21 }
  0x93   : > { %1201 = vmatmul.mubr.bf16.gmra.mrb[12].mxu0 %v1335_v22  ;;  %1217 = vmatmul.mubr.bf16.gmra.mrb[12].mxu1 %v1336_v23 }
 0x14e   : > { %v1190_v25 = vpop.f32.mrb[0].mxu0  ;;  %v1206_v27 = vpop.f32.mrb[0].mxu1 }
 0x14f   : > { %v827_v28 = vmul.f32 %v1190_v25, %v1706_v24  ;;  %v843_v29 = vmul.f32 %v1206_v27, %v1706_v24  ;;  %v592_v30 = vpop.f32.mrb[1].mxu0  ;;  %v656_v31 = vpop.f32.mrb[1].mxu1 }
 0x150   : > { %v825_v32 = vmul.f32 %v1706_v24, %v592_v30  ;;  %v841_v33 = vmul.f32 %v1706_v24, %v656_v31  ;;  %v1191_v34 = vpop.f32.mrb[2].mxu0  ;;  %v1207_v35 = vpop.f32.mrb[2].mxu1 }
 0x151   : > { %v866_v36 = vadd.f32 %v1711_v26, %v827_v28  ;;  %v882_v37 = vadd.f32 %v1711_v26, %v843_v29  ;;  %v828_v38 = vmul.f32 %v1191_v34, %v1706_v24  ;;  %v844_v39 = vmul.f32 %v1207_v35, %v1706_v24  ;;  %v595_v40 = vpop.f32.mrb[3].mxu0  ;;  %v659_v41 = vpop.f32.mrb[3].mxu1 }
 0x152   : > { %v864_v42 = vadd.f32 %v1711_v26, %v825_v32  ;;  %v880_v43 = vadd.f32 %v1711_v26, %v841_v33  ;;  %v826_v44 = vmul.f32 %v1706_v24, %v595_v40  ;;  %v842_v45 = vmul.f32 %v1706_v24, %v659_v41 }
 0x153   : > { %v898_v46 = vmax.f32 %v866_v36, 0.0  ;;  %v914_v47 = vmax.f32 %v882_v37, 0.0  ;;  %v867_v48 = vadd.f32 %v1711_v26, %v828_v38  ;;  %v883_v49 = vadd.f32 %v1711_v26, %v844_v39 }
 0x154   : > { %v896_v50 = vmax.f32 %v864_v42, 0.0  ;;  %v912_v51 = vmax.f32 %v880_v43, 0.0  ;;  %v865_v52 = vadd.f32 %v1711_v26, %v826_v44  ;;  %v881_v53 = vadd.f32 %v1711_v26, %v842_v45 }
 0x155   : > { %930 = vst [vmem:[%s1730_s22 + $0x10] sm:$0xff] %v898_v46  ;;  %946 = vst [vmem:[%s1730_s22 + $0x90] sm:$0xff] %v914_v47  ;;  %v899_v54 = vmax.f32 %v867_v48, 0.0  ;;  %v915_v55 = vmax.f32 %v883_v49, 0.0 }
 0x156   : > { %928 = vst [vmem:[%s1730_s22] sm:$0xff] %v896_v50  ;;  %944 = vst [vmem:[%s1730_s22 + $0x80] sm:$0xff] %v912_v51  ;;  %v897_v56 = vmax.f32 %v865_v52, 0.0  ;;  %v913_v57 = vmax.f32 %v881_v53, 0.0  ;;  %v1194_v58 = vpop.f32.mrb[4].mxu0  ;;  %v1210_v59 = vpop.f32.mrb[4].mxu1 }
 0x157   : > { %931 = vst [vmem:[%s1730_s22 + $0x18] sm:$0xff] %v899_v54  ;;  %947 = vst [vmem:[%s1730_s22 + $0x98] sm:$0xff] %v915_v55  ;;  %v831_v60 = vmul.f32 %v1194_v58, %v1706_v24  ;;  %v847_v61 = vmul.f32 %v1210_v59, %v1706_v24  ;;  %v608_v62 = vpop.f32.mrb[5].mxu0  ;;  %v672_v63 = vpop.f32.mrb[5].mxu1 }
 0x158   : > { %929 = vst [vmem:[%s1730_s22 + $0x8] sm:$0xff] %v897_v56  ;;  %945 = vst [vmem:[%s1730_s22 + $0x88] sm:$0xff] %v913_v57  ;;  %v829_v0 = vmul.f32 %v1706_v24, %v608_v62  ;;  %v845_v1 = vmul.f32 %v1706_v24, %v672_v63  ;;  %v1195_v2 = vpop.f32.mrb[6].mxu0  ;;  %v1211_v3 = vpop.f32.mrb[6].mxu1 }
 0x159   : > { %v870_v4 = vadd.f32 %v1711_v26, %v831_v60  ;;  %v886_v5 = vadd.f32 %v1711_v26, %v847_v61  ;;  %v832_v6 = vmul.f32 %v1195_v2, %v1706_v24  ;;  %v848_v7 = vmul.f32 %v1211_v3, %v1706_v24  ;;  %v611_v8 = vpop.f32.mrb[7].mxu0  ;;  %v675_v9 = vpop.f32.mrb[7].mxu1 }
 0x15a   : > { %v868_v10 = vadd.f32 %v1711_v26, %v829_v0  ;;  %v884_v11 = vadd.f32 %v1711_v26, %v845_v1  ;;  %v830_v12 = vmul.f32 %v1706_v24, %v611_v8  ;;  %v846_v13 = vmul.f32 %v1706_v24, %v675_v9 }
 0x15b   : > { %v902_v14 = vmax.f32 %v870_v4, 0.0  ;;  %v918_v15 = vmax.f32 %v886_v5, 0.0  ;;  %v871_v16 = vadd.f32 %v1711_v26, %v832_v6  ;;  %v887_v17 = vadd.f32 %v1711_v26, %v848_v7 }
 0x15c   : > { %v900_v18 = vmax.f32 %v868_v10, 0.0  ;;  %v916_v19 = vmax.f32 %v884_v11, 0.0  ;;  %v869_v20 = vadd.f32 %v1711_v26, %v830_v12  ;;  %v885_v21 = vadd.f32 %v1711_v26, %v846_v13 }
 0x15d   : > { %934 = vst [vmem:[%s1730_s22 + $0x30] sm:$0xff] %v902_v14  ;;  %950 = vst [vmem:[%s1730_s22 + $0xb0] sm:$0xff] %v918_v15  ;;  %v903_v22 = vmax.f32 %v871_v16, 0.0  ;;  %v919_v23 = vmax.f32 %v887_v17, 0.0 }
 0x15e   : > { %932 = vst [vmem:[%s1730_s22 + $0x20] sm:$0xff] %v900_v18  ;;  %948 = vst [vmem:[%s1730_s22 + $0xa0] sm:$0xff] %v916_v19  ;;  %v901_v25 = vmax.f32 %v869_v20, 0.0  ;;  %v917_v27 = vmax.f32 %v885_v21, 0.0  ;;  %v1198_v28 = vpop.f32.mrb[8].mxu0  ;;  %v1214_v29 = vpop.f32.mrb[8].mxu1 }
 0x15f   : > { %935 = vst [vmem:[%s1730_s22 + $0x38] sm:$0xff] %v903_v22  ;;  %951 = vst [vmem:[%s1730_s22 + $0xb8] sm:$0xff] %v919_v23  ;;  %v835_v30 = vmul.f32 %v1198_v28, %v1706_v24  ;;  %v851_v31 = vmul.f32 %v1214_v29, %v1706_v24  ;;  %v624_v32 = vpop.f32.mrb[9].mxu0  ;;  %v688_v33 = vpop.f32.mrb[9].mxu1 }
 0x160   : > { %933 = vst [vmem:[%s1730_s22 + $0x28] sm:$0xff] %v901_v25  ;;  %949 = vst [vmem:[%s1730_s22 + $0xa8] sm:$0xff] %v917_v27  ;;  %v833_v34 = vmul.f32 %v1706_v24, %v624_v32  ;;  %v849_v35 = vmul.f32 %v1706_v24, %v688_v33  ;;  %v1199_v36 = vpop.f32.mrb[10].mxu0  ;;  %v1215_v37 = vpop.f32.mrb[10].mxu1 }
 0x161   : > { %v874_v38 = vadd.f32 %v1711_v26, %v835_v30  ;;  %v890_v39 = vadd.f32 %v1711_v26, %v851_v31  ;;  %v836_v40 = vmul.f32 %v1199_v36, %v1706_v24  ;;  %v852_v41 = vmul.f32 %v1215_v37, %v1706_v24  ;;  %v627_v42 = vpop.f32.mrb[11].mxu0  ;;  %v691_v43 = vpop.f32.mrb[11].mxu1 }
 0x162   : > { %v872_v44 = vadd.f32 %v1711_v26, %v833_v34  ;;  %v888_v45 = vadd.f32 %v1711_v26, %v849_v35  ;;  %v834_v46 = vmul.f32 %v1706_v24, %v627_v42  ;;  %v850_v47 = vmul.f32 %v1706_v24, %v691_v43 }
 0x163   : > { %v906_v48 = vmax.f32 %v874_v38, 0.0  ;;  %v922_v49 = vmax.f32 %v890_v39, 0.0  ;;  %v875_v50 = vadd.f32 %v1711_v26, %v836_v40  ;;  %v891_v51 = vadd.f32 %v1711_v26, %v852_v41 }
 0x164   : > { %v904_v52 = vmax.f32 %v872_v44, 0.0  ;;  %v920_v53 = vmax.f32 %v888_v45, 0.0  ;;  %v873_v54 = vadd.f32 %v1711_v26, %v834_v46  ;;  %v889_v55 = vadd.f32 %v1711_v26, %v850_v47 }
 0x165   : > { %938 = vst [vmem:[%s1730_s22 + $0x50] sm:$0xff] %v906_v48  ;;  %954 = vst [vmem:[%s1730_s22 + $0xd0] sm:$0xff] %v922_v49  ;;  %v907_v56 = vmax.f32 %v875_v50, 0.0  ;;  %v923_v57 = vmax.f32 %v891_v51, 0.0 }
 0x166   : > { %936 = vst [vmem:[%s1730_s22 + $0x40] sm:$0xff] %v904_v52  ;;  %952 = vst [vmem:[%s1730_s22 + $0xc0] sm:$0xff] %v920_v53  ;;  %v905_v58 = vmax.f32 %v873_v54, 0.0  ;;  %v921_v59 = vmax.f32 %v889_v55, 0.0  ;;  %v1202_v60 = vpop.f32.mrb[12].mxu0  ;;  %v1218_v61 = vpop.f32.mrb[12].mxu1 }
 0x167   : > { %939 = vst [vmem:[%s1730_s22 + $0x58] sm:$0xff] %v907_v56  ;;  %955 = vst [vmem:[%s1730_s22 + $0xd8] sm:$0xff] %v923_v57  ;;  %v839_v62 = vmul.f32 %v1202_v60, %v1706_v24  ;;  %v855_v63 = vmul.f32 %v1218_v61, %v1706_v24  ;;  %v640_v0 = vpop.f32.mrb[13].mxu0  ;;  %v704_v1 = vpop.f32.mrb[13].mxu1 }
 0x168   : > { %937 = vst [vmem:[%s1730_s22 + $0x48] sm:$0xff] %v905_v58  ;;  %953 = vst [vmem:[%s1730_s22 + $0xc8] sm:$0xff] %v921_v59  ;;  %v837_v2 = vmul.f32 %v1706_v24, %v640_v0  ;;  %v853_v3 = vmul.f32 %v1706_v24, %v704_v1  ;;  %v1203_v4 = vpop.f32.mrb[14].mxu0  ;;  %v1219_v5 = vpop.f32.mrb[14].mxu1 }
 0x169   : > { %v878_v6 = vadd.f32 %v1711_v26, %v839_v62  ;;  %v894_v7 = vadd.f32 %v1711_v26, %v855_v63  ;;  %v840_v8 = vmul.f32 %v1203_v4, %v1706_v24  ;;  %v856_v9 = vmul.f32 %v1219_v5, %v1706_v24  ;;  %v643_v10 = vpop.f32.mrb[15].mxu0  ;;  %v707_v11 = vpop.f32.mrb[15].mxu1 }
 0x16a   : > { %v876_v12 = vadd.f32 %v1711_v26, %v837_v2  ;;  %v892_v13 = vadd.f32 %v1711_v26, %v853_v3  ;;  %v838_v14 = vmul.f32 %v1706_v24, %v643_v10  ;;  %v854_v15 = vmul.f32 %v1706_v24, %v707_v11 }
 0x16b   : > { %v910_v16 = vmax.f32 %v878_v6, 0.0  ;;  %v926_v17 = vmax.f32 %v894_v7, 0.0  ;;  %v879_v18 = vadd.f32 %v1711_v26, %v840_v8  ;;  %v895_v19 = vadd.f32 %v1711_v26, %v856_v9 }
 0x16c   : > { %v908_v20 = vmax.f32 %v876_v12, 0.0  ;;  %v924_v21 = vmax.f32 %v892_v13, 0.0  ;;  %v877_v22 = vadd.f32 %v1711_v26, %v838_v14  ;;  %v893_v24 = vadd.f32 %v1711_v26, %v854_v15 }
 0x16d   : > { %942 = vst [vmem:[%s1730_s22 + $0x70] sm:$0xff] %v910_v16  ;;  %958 = vst [vmem:[%s1730_s22 + $0xf0] sm:$0xff] %v926_v17  ;;  %v911_v23 = vmax.f32 %v879_v18, 0.0  ;;  %v927_v25 = vmax.f32 %v895_v19, 0.0 }
 0x16e   : > { %940 = vst [vmem:[%s1730_s22 + $0x60] sm:$0xff] %v908_v20  ;;  %956 = vst [vmem:[%s1730_s22 + $0xe0] sm:$0xff] %v924_v21  ;;  %v909_v27 = vmax.f32 %v877_v22, 0.0  ;;  %v925_v28 = vmax.f32 %v893_v24, 0.0 }
 0x16f   : > { %943 = vst [vmem:[%s1730_s22 + $0x78] sm:$0xff] %v911_v23  ;;  %959 = vst [vmem:[%s1730_s22 + $0xf8] sm:$0xff] %v927_v25 }
 0x170   : > { %941 = vst [vmem:[%s1730_s22 + $0x68] sm:$0xff] %v909_v27  ;;  %957 = vst [vmem:[%s1730_s22 + $0xe8] sm:$0xff] %v925_v28 }
 0x171   : > { %1408 = shalt.err (!%p1405_p5)
}
 0x172   : > { %s1409_s23 = scalar_lea.hbm %s1811_s9, 4096  ;;  %s1413_s14 = scalar_lea.hbm %s1872_s4, 8192 }
 0x173   : > { %p1410_p9 = scmp.ne.s32.totalorder %s1811_s9, %s1409_s23  ;;  %p1414_p3 = scmp.lt.u32.totalorder %s1811_s9, %s1872_s4 }
 0x174   : > { %p1415_p7 = scmp.lt.u32.totalorder %s1413_s14, %s1409_s23  ;;  %p1417_p4 = scmp.lt.u32.totalorder %s1409_s23, %s1811_s9 }
 0x175   : > { %p1411_p1 = pnand %p1410_p9, %p1614_p10 }
 0x176   : > { %p1416_p13 = por %p1415_p7, %p1414_p3 }
 0x177   : > { %p1412_p2 = pneg %p1411_p1 }
 0x178   : > { %p1418_p6 = por %p1417_p4, %p1416_p13 }
 0x17a   : > { %p1419_p8 = pnand %p1418_p6, %p1412_p2 }
 0x17c   : > { %1422 = shalt.err (!%p1419_p8)
}
 0x17d   : > { %s1488_s28 = smov 128   ;;  %s1489_s18 = smov 8  }
 0x17e   : > { %1242 = dma.vmem_to_hbm [thread:$0]  (%p1614_p10), %s1813_s8, 4096, %s1811_s9, %s961_s11, %s1488_s28, %s1488_s28, %s1489_s18  }
 0x17f PF: > { %s990_s6 = sand.u32 1, %s1461_s15   ;;  %p1890_p12 = scmp.ne.s32.totalorder %s1880_s26, 0 }
 0x180   : > { %p1891_p11 = scmp.ge.s32.totalorder %s1481_s20, 2  ;;  %s991_s13 = scalar_lea.sflag [#allocation5], %s990_s6 }
 0x182   : > { %p1253_p0 = pnand %p1891_p11, %p1890_p12 }
 0x184   : > { %1456 = dma.done.wait (!%p1253_p0), %s991_s13, 4096  }
 0x185   : > { %1458 = vsyncadd (!%p1253_p0), %s991_s13, 4294963200  ;;  %s21_s20 = sadd.s32 1, %s1481_s20   ;;  %s1892_s15 = smov %s1465_s16 }
 0x186   : > { %p18_p5 = scmp.ge.s32.totalorder %s21_s20, 4   ;;  %s1893_s16 = smov %s1469_s17 }
 0x187   : > { %s1894_s17 = smov %s1623_s10  ;;  %s1895_s18 = smov %s1477_s19 }
 0x188   : > { %s1896_s19 = smov %s1898_s5  ;;  %20 = sbr.rel (!%p18_p5) target bundleno = 7 (0x7), region = 100 }
 0x18f   :  { %996 = vsyncpa [#allocation4], 1 }
 0x190   :  { %998 = vsyncpa [#allocation4 + $0x1], 1 }
 0x191   :  { %999 = vsyncpa [#allocation7], 1 }
 0x192   :  { %1000 = vsyncpa [#allocation5], 1 }
 0x193   :  { %1002 = vsyncpa [#allocation5 + $0x1], 1 }

</bundles_post_ra>
